<compile_context>
chip_gen: v5e
topology: v5e:2x2
jax: 0.10.0
libtpu: 0.0.40
codegen_flags: <defaults>
</compile_context>

<pallas_src>
import functools

import jax
import jax.numpy as jnp
from jax.experimental import pallas as pl
from jax.experimental.pallas import tpu as pltpu

NUM_CORE_SPLIT = 2  # leading "parallel" grid axis; uses both TCs on v7x


def _round_up(x, m):
    return ((x + m - 1) // m) * m


def _custom_loss_kernel(packed_ref, beta_ref, out_ref, acc_ref, *,
                        F, bm, n_rows, nb_per_core, lambda_phy, inv_n):
    c_split = pl.program_id(0)          # core-split axis ("parallel")
    blk_i = pl.program_id(1)            # batch-block axis ("arbitrary")

    @pl.when(blk_i == 0)
    def _():                            # reset this core's accumulator
        acc_ref[...] = jnp.zeros_like(acc_ref)

    blk = packed_ref[...].astype(jnp.float32)        # (bm, 2F+3), upcast in-kernel
    c = blk[:, 0:F]                                  # (bm, F)
    d = blk[:, F:F + 1]                              # (bm, 1)
    A = blk[:, F + 1:2 * F + 1]                      # (bm, F)
    y = blk[:, 2 * F + 1:2 * F + 2]                  # (bm, 1)
    b_tl = blk[:, 2 * F + 2:2 * F + 3]               # (bm, 1)

    beta = beta_ref[...].astype(jnp.float32)         # (1, F) broadcasts over rows

    # diag(A @ (beta + c).T)[i] == sum_k A[i,k] * (beta[k] + c[i,k])
    # Keep it as elementwise multiply + lane reduce (VPU + XLU); never the
    # O(N^2) MXU matmul.
    tmp = jnp.sum(A * (beta + c), axis=1, keepdims=True) + d   # (bm, 1)

    e_data = tmp - y
    e_prior = tmp - b_tl
    err = e_data * e_data + lambda_phy * (e_prior * e_prior)   # (bm, 1)

    # Mask rows past the true batch size (tail block / clamped duplicate blocks).
    row = jax.lax.broadcasted_iota(jnp.int32, (bm, 1), 0)
    global_row = (c_split * nb_per_core + blk_i) * bm + row
    err = jnp.where(global_row < n_rows, err, 0.0)

    acc_ref[...] += jnp.sum(err)                     # running sum of squared errors

    @pl.when(blk_i == pl.num_programs(1) - 1)
    def _():                                         # finalize with precomputed 1/N
        out_ref[0] = acc_ref[...] * inv_n


def custom_loss(model_output, y, A, B_tl, beta_TL,
                lambda_phy=1.0, block_rows=4096):
    """Scalar loss matching CustomLoss.forward (returns shape () float32)."""
    N, F1 = model_output.shape
    F = F1 - 1                                       # 18 coefficient columns
    assert A.shape == (N, F), (A.shape, N, F)

    # Pack in the native input dtype (no wrapper-side f32 cast pass).
    in_dtype = jnp.result_type(model_output.dtype, A.dtype, y.dtype, B_tl.dtype)
    packed = jnp.concatenate(
        [model_output.astype(in_dtype),              # [c | d]
         A.astype(in_dtype),
         y.reshape(N, 1).astype(in_dtype),
         B_tl.reshape(N, 1).astype(in_dtype)],
        axis=1)                                      # (N, 2F+3)
    W = 2 * F + 3

    beta2d = beta_TL.reshape(1, F).astype(jnp.float32)   # tiny parameter

    # Batch tiling: multiple of 8 rows per block (sublane constraint),
    # large blocks for HBM-roofline streaming (sweep block_rows 1024-8192;
    # 4096 rows * 128 lanes * 4 B * 2 buffers = 4 MiB, fits every chip's
    # default scoped VMEM incl. v7x).
    bm = min(_round_up(block_rows, 8), _round_up(N, 8))
    nb_total = pl.cdiv(N, bm)
    nb_per_core = pl.cdiv(nb_total, NUM_CORE_SPLIT)
    inv_n = 1.0 / N

    kernel = functools.partial(
        _custom_loss_kernel, F=F, bm=bm, n_rows=N, nb_per_core=nb_per_core,
        lambda_phy=float(lambda_phy), inv_n=inv_n)

    def packed_map(csplit, i):
        # Clamp fully-out-of-range blocks onto the last real block; their rows
        # are masked out inside the kernel by the (unclamped) global row index.
        return (jnp.minimum(csplit * nb_per_core + i, nb_total - 1), 0)

    partials = pl.pallas_call(
        kernel,
        out_shape=jax.ShapeDtypeStruct((NUM_CORE_SPLIT, 1, 1), jnp.float32),
        grid_spec=pltpu.PrefetchScalarGridSpec(
            num_scalar_prefetch=0,
            grid=(NUM_CORE_SPLIT, nb_per_core),
            in_specs=[
                pl.BlockSpec((bm, W), packed_map),          # packed data slab
                pl.BlockSpec((1, F), lambda c, i: (0, 0)),  # beta, resident
            ],
            out_specs=pl.BlockSpec((1, 1, 1), lambda c, i: (c, 0, 0)),
            scratch_shapes=[pltpu.VMEM((1, 1), jnp.float32)],  # per-core accumulator
        ),
        compiler_params=pltpu.CompilerParams(
            dimension_semantics=("parallel", "arbitrary")),
    )(packed, beta2d)

    # Each per-core partial is already scaled by 1/N; final combine is a tiny op.
    return jnp.sum(partials)


def custom_loss_ref(model_output, y, A, B_tl, beta_TL, lambda_phy=1.0):
    F = A.shape[1]
    c = model_output[:, :F]
    d = model_output[:, F].reshape(-1, 1)
    tmp = jnp.diag(A @ (beta_TL.reshape(1, -1) + c).T).reshape(-1, 1) + d
    l_data = jnp.mean((tmp - y.reshape(-1, 1)) ** 2)
    l_prior = jnp.mean((tmp - B_tl.reshape(-1, 1)) ** 2)
    return l_data + lambda_phy * l_prior


if __name__ == "__main__":
    key = jax.random.PRNGKey(0)
    k1, k2, k3, k4, k5 = jax.random.split(key, 5)

    # Small shapes consistent with the module: batch=8, 18 coeff cols + 1 offset.
    N = 8
    model_output = jax.random.normal(k1, (N, 19), dtype=jnp.float32)
    y = jax.random.normal(k2, (N, 1), dtype=jnp.float32)
    A = jax.random.normal(k3, (N, 18), dtype=jnp.float32)
    B_tl = jax.random.normal(k4, (N, 1), dtype=jnp.float32)
    beta_TL = jax.random.normal(k5, (18,), dtype=jnp.float32)

    loss = custom_loss(model_output, y, A, B_tl, beta_TL)
    jax.block_until_ready(loss)
    ref = custom_loss_ref(model_output, y, A, B_tl, beta_TL)
    assert jnp.allclose(loss, ref, atol=1e-4, rtol=1e-4), (loss, ref)

    # Second check: batch not a multiple of the block, several grid blocks, both
    # core-split partials exercised (tail masking + clamped index map).
    N2 = 100
    kk = jax.random.split(jax.random.PRNGKey(1), 4)
    mo2 = jax.random.normal(kk[0], (N2, 19), dtype=jnp.float32)
    y2 = jax.random.normal(kk[1], (N2, 1), dtype=jnp.float32)
    A2 = jax.random.normal(kk[2], (N2, 18), dtype=jnp.float32)
    b2 = jax.random.normal(kk[3], (N2, 1), dtype=jnp.float32)
    loss2 = custom_loss(mo2, y2, A2, b2, beta_TL, block_rows=16)
    jax.block_until_ready(loss2)
    ref2 = custom_loss_ref(mo2, y2, A2, b2, beta_TL)
    assert jnp.allclose(loss2, ref2, atol=1e-4, rtol=1e-4), (loss2, ref2)

    print("KERNEL_OK")
</pallas_src>

<mosaic_0001>
module attributes {stable_mosaic.version = 11 : i64} {
  func.func @_custom_loss_kernel(%arg0: i32, %arg1: i32, %arg2: memref<8x39xf32, #tpu.memory_space<vmem>>, %arg3: memref<1x18xf32, #tpu.memory_space<vmem>>, %arg4: memref<1x1x1xf32, #tpu.memory_space<vmem>>, %arg5: memref<1x1xf32, #tpu.memory_space<vmem>>) attributes {dimension_semantics = [#tpu.dimension_semantics<parallel>, #tpu.dimension_semantics<arbitrary>], iteration_bounds = array<i64: 2, 1>, scalar_prefetch = 0 : i64, scratch_operands = 1 : i64, tpu.core_type = #tpu.core_type<tc>, window_params = [{transform_indices = @transform_0, window_bounds = array<i64: 8, 39>}, {pipeline_mode = #tpu.pipeline_mode<synchronous>, transform_indices = @transform_1, window_bounds = array<i64: 1, 18>}, {transform_indices = @transform_2, window_bounds = array<i64: 1, 1, 1>}]} {
    %c0_i32 = arith.constant 0 : i32
    %0 = arith.cmpi eq, %arg1, %c0_i32 : i32
    %1 = arith.extui %0 : i1 to i32
    %c0_i32_0 = arith.constant 0 : i32
    %2 = arith.cmpi ne, %1, %c0_i32_0 : i32
    scf.if %2 {
      %cst_14 = arith.constant 0.000000e+00 : f32
      %44 = vector.broadcast %cst_14 : f32 to vector<1x1xf32>
      %c0_15 = arith.constant 0 : index
      %c0_16 = arith.constant 0 : index
      %45 = vector.load %arg5[%c0_15, %c0_16] : memref<1x1xf32, #tpu.memory_space<vmem>>, vector<1x1xf32>
      tpu.vector_store %arg5[%c0_15, %c0_16], %44 {strides = array<i32>} : memref<1x1xf32, #tpu.memory_space<vmem>>, vector<1x1xf32>,
    } else {
    }
    %c0 = arith.constant 0 : index
    %c0_1 = arith.constant 0 : index
    %3 = vector.load %arg2[%c0, %c0_1] : memref<8x39xf32, #tpu.memory_space<vmem>>, vector<8x39xf32>
    %4 = vector.extract_strided_slice %3 {offsets = [0, 0], sizes = [8, 18], strides = [1, 1]} : vector<8x39xf32> to vector<8x18xf32>
    %5 = vector.extract_strided_slice %3 {offsets = [0, 18], sizes = [8, 1], strides = [1, 1]} : vector<8x39xf32> to vector<8x1xf32>
    %6 = vector.extract_strided_slice %3 {offsets = [0, 19], sizes = [8, 18], strides = [1, 1]} : vector<8x39xf32> to vector<8x18xf32>
    %7 = vector.extract_strided_slice %3 {offsets = [0, 37], sizes = [8, 1], strides = [1, 1]} : vector<8x39xf32> to vector<8x1xf32>
    %8 = vector.extract_strided_slice %3 {offsets = [0, 38], sizes = [8, 1], strides = [1, 1]} : vector<8x39xf32> to vector<8x1xf32>
    %c0_2 = arith.constant 0 : index
    %c0_3 = arith.constant 0 : index
    %9 = vector.load %arg3[%c0_2, %c0_3] : memref<1x18xf32, #tpu.memory_space<vmem>>, vector<1x18xf32>
    %10 = vector.broadcast %9 : vector<1x18xf32> to vector<8x18xf32>
    %11 = arith.addf %10, %4 : vector<8x18xf32>
    %12 = arith.mulf %6, %11 : vector<8x18xf32>
    %cst = arith.constant dense<0.000000e+00> : vector<8xf32>
    %13 = vector.multi_reduction <add>, %12, %cst [1] : vector<8x18xf32> to vector<8xf32>
    %14 = vector.shape_cast %13 : vector<8xf32> to vector<8x1xf32>
    %15 = arith.addf %14, %5 : vector<8x1xf32>
    %16 = arith.subf %15, %7 : vector<8x1xf32>
    %17 = arith.subf %15, %8 : vector<8x1xf32>
    %18 = arith.mulf %16, %16 : vector<8x1xf32>
    %19 = arith.mulf %17, %17 : vector<8x1xf32>
    %cst_4 = arith.constant 1.000000e+00 : f32
    %20 = vector.broadcast %cst_4 : f32 to vector<8x1xf32>
    %21 = arith.mulf %20, %19 : vector<8x1xf32>
    %22 = arith.addf %18, %21 : vector<8x1xf32>
    %23 = tpu.iota {dimensions = array<i32: 0>} : vector<8x1xi32>
    %c1_i32 = arith.constant 1 : i32
    %24 = arith.muli %arg0, %c1_i32 : i32
    %25 = arith.addi %24, %arg1 : i32
    %c8_i32 = arith.constant 8 : i32
    %26 = arith.muli %25, %c8_i32 : i32
    %27 = vector.broadcast %26 : i32 to vector<8x1xi32>
    %28 = arith.addi %27, %23 : vector<8x1xi32>
    %c8_i32_5 = arith.constant 8 : i32
    %29 = vector.broadcast %c8_i32_5 : i32 to vector<8x1xi32>
    %30 = arith.cmpi slt, %28, %29 : vector<8x1xi32>
    %cst_6 = arith.constant 0.000000e+00 : f32
    %31 = vector.broadcast %cst_6 : f32 to vector<8x1xf32>
    %32 = arith.select %30, %22, %31 : vector<8x1xi1>, vector<8x1xf32>
    %c0_7 = arith.constant 0 : index
    %c0_8 = arith.constant 0 : index
    %33 = vector.load %arg5[%c0_7, %c0_8] : memref<1x1xf32, #tpu.memory_space<vmem>>, vector<1x1xf32>
    %34 = vector.shape_cast %32 : vector<8x1xf32> to vector<1x8x1xf32>
    %cst_9 = arith.constant dense<0.000000e+00> : vector<1xf32>
    %35 = vector.multi_reduction <add>, %34, %cst_9 [1, 2] : vector<1x8x1xf32> to vector<1xf32>
    %36 = vector.shape_cast %35 : vector<1xf32> to vector<1x1x1xf32>
    %37 = vector.extract %36[0, 0, 0] : f32 from vector<1x1x1xf32>
    %38 = vector.broadcast %37 : f32 to vector<1x1xf32>
    %39 = arith.addf %33, %38 : vector<1x1xf32>
    %c0_10 = arith.constant 0 : index
    %c0_11 = arith.constant 0 : index
    %40 = vector.load %arg5[%c0_10, %c0_11] : memref<1x1xf32, #tpu.memory_space<vmem>>, vector<1x1xf32>
    tpu.vector_store %arg5[%c0_10, %c0_11], %39 {strides = array<i32>} : memref<1x1xf32, #tpu.memory_space<vmem>>, vector<1x1xf32>,
    %c0_i32_12 = arith.constant 0 : i32
    %41 = arith.cmpi eq, %arg1, %c0_i32_12 : i32
    %42 = arith.extui %41 : i1 to i32
    %c0_i32_13 = arith.constant 0 : i32
    %43 = arith.cmpi ne, %42, %c0_i32_13 : i32
    scf.if %43 {
      %c0_14 = arith.constant 0 : index
      %c0_15 = arith.constant 0 : index
      %44 = vector.load %arg5[%c0_14, %c0_15] : memref<1x1xf32, #tpu.memory_space<vmem>>, vector<1x1xf32>
      %cst_16 = arith.constant 1.250000e-01 : f32
      %45 = vector.broadcast %cst_16 : f32 to vector<1x1xf32>
      %46 = arith.mulf %44, %45 : vector<1x1xf32>
      %c0_17 = arith.constant 0 : index
      %c0_18 = arith.constant 0 : index
      %c0_19 = arith.constant 0 : index
      %47 = vector.load %arg4[%c0_17, %c0_18, %c0_19] : memref<1x1x1xf32, #tpu.memory_space<vmem>>, vector<1x1x1xf32>
      %48 = vector.shape_cast %47 : vector<1x1x1xf32> to vector<1x1xf32>
      %49 = vector.shape_cast %46 : vector<1x1xf32> to vector<1x1x1xf32>
      tpu.vector_store %arg4[%c0_17, %c0_18, %c0_19], %49 {strides = array<i32>} : memref<1x1x1xf32, #tpu.memory_space<vmem>>, vector<1x1x1xf32>,
    } else {
    }
    return
  }
  func.func @transform_0(%arg0: i32, %arg1: i32) -> (i32, i32) {
    %c1_i32 = arith.constant 1 : i32
    %0 = arith.muli %arg0, %c1_i32 : i32
    %1 = arith.addi %0, %arg1 : i32
    %c0_i32 = arith.constant 0 : i32
    %2 = arith.minsi %1, %c0_i32 : i32
    %c0_i32_0 = arith.constant 0 : i32
    %c0_i32_1 = arith.constant 0 : i32
    return %2, %c0_i32_0 : i32, i32
  }
  func.func @transform_1(%arg0: i32, %arg1: i32) -> (i32, i32) {
    %c0_i32 = arith.constant 0 : i32
    %c0_i32_0 = arith.constant 0 : i32
    %c0_i32_1 = arith.constant 0 : i32
    return %c0_i32, %c0_i32_0 : i32, i32
  }
  func.func @transform_2(%arg0: i32, %arg1: i32) -> (i32, i32, i32) {
    %c0_i32 = arith.constant 0 : i32
    %c0_i32_0 = arith.constant 0 : i32
    %c0_i32_1 = arith.constant 0 : i32
    return %arg0, %c0_i32, %c0_i32_0 : i32, i32, i32
  }
}

</mosaic_0001>

<bundles_post_ra>
// kernel: tpu_custom_call.1
= control target key start
LH: loop header
LB: loop body
LE: loop exit
PB: predicated region body
PF: predicated region fallthrough
CT: control target
= control target key end

     0   :  { %7 = vsyncpa [#allocation4], 0  ;;  %s663_s0 = inlined_call_operand.hbm [shape: f32[8,39], index: 0, kind: input, shape index: {}]   ;;  %s664_s1 = inlined_call_operand.hbm [shape: f32[1,18], index: 1, kind: input, shape index: {}]   ;;  %s665_s2 = inlined_call_operand.vmem [shape: f32[2,1,1], index: 2, kind: output, shape index: {}]  }
   0x1   :  { %9 = vsyncpa [#allocation4 + $0x1], 0 }
   0x2   :  { %10 = vsyncpa [#allocation6], 0  ;;  %s569_s9 = smov 0   ;;  %s571_s10 = smov 0  }
   0x3   :  { %s573_s11 = smov 0   ;;  %s575_s12 = smov 0  }
   0x4   :  { %s577_s13 = smov 0  }
   0x5 LB: > { %s347_s14 = sadd.s32 4294967295, %s545_s13   ;;  %p54_p0 = scmp.ne.s32.totalorder %s533_s10, %s529_s9  ;;  %s545_s13 = sphi %s577_s13, %s16_s13   ;;  %s541_s12 = sphi %s575_s12, %s671_s12   ;;  %s537_s11 = sphi %s573_s11, %s670_s11   ;;  %s533_s10 = sphi %s571_s10, %s653_s10   ;;  %s529_s9 = sphi %s569_s9, %s669_s9  }
   0x6   : > { %p594_p1 = scmp.eq.s32.totalorder %s347_s14, 0  ;;  %p349_p2 = scmp.ge.s32.totalorder %s545_s13, 1 }
   0x7   : > { %p112_p3 = scmp.lt.s32.totalorder %s545_s13, 3  ;;  %s124_s19 = sshll.u32 %s664_s1, 4  ;;  %s125_s19 = int_to_ptr.hbm [resolvable:$true] %s124_s19 }
   0x8   : > { %p602_p4 = por %p594_p1, %p54_p0  ;;  %s547_s21 = smov [#allocation5]  }
   0x9   : > { %p609_p5 = pnand %p349_p2, %p112_p3  ;;  %s126_s22 = sshll.u32 %s547_s21, 4  ;;  %s127_s22 = int_to_ptr.vmem [resolvable:$true] %s126_s22 }
   0xa   : > { %s28_s23 = sadd.s32 1, %s541_s12  ;;  %p526_p9 = scmp.ne.s32.totalorder %s533_s10, 0 }
   0xb   : > { %p368_p6 = pneg %p609_p5  ;;  %p30_p8 = scmp.ge.s32.totalorder %s28_s23, 2 }
   0xc   : > { %p49_p10 = scmp.eq.s32.totalorder %s545_s13, 0  ;;  %p377_p11 = scmp.lt.s32.totalorder %s545_s13, 2 }
   0xd   : > { %p369_p7 = pnand %p368_p6, %p594_p1  ;;  %s673_s23 = smov (%p30_p8, %s28_s23), 0 }
   0xe   : > { %p50_p12 = por %p526_p9, %p49_p10  ;;  %s548_s24 = smov [#allocation3]  }
   0xf   : > { %371 = dma.hbm_to_vmem [thread:$0]  (!%p369_p7), %s125_s19, 16, %s127_s22, [#allocation6]  }
  0x10   : > { %s152_s25 = sshll.u32 %s548_s24, 4  ;;  %s150_s28 = sshll.u32 %s663_s0, 4  ;;  %s153_s25 = int_to_ptr.vmem [resolvable:$true] %s152_s25  ;;  %s151_s28 = int_to_ptr.hbm [resolvable:$true] %s150_s28 }
  0x11   : > { %p373_p13 = pnand %p377_p11, %p50_p12  ;;  %s464_s29 = sshra.s32 %s151_s28, 4  ;;  %s465_s29 = int_to_ptr.hbm [resolvable:$true] %s464_s29 }
  0x12   : > { %s466_s30 = scalar_lea.hbm %s465_s29, 8  ;;  %s471_s5 = scalar_lea.hbm %s663_s0, 8 }
  0x13   : > { %p467_p0 = scmp.ne.s32.totalorder %s465_s29, %s466_s30  ;;  %p468_p2 = pneg %p373_p13 }
  0x14   : > { %p473_p7 = scmp.lt.s32.totalorder %s471_s5, %s466_s30 }
  0x15   : > { %p469_p3 = pnand %p468_p2, %p467_p0 }
  0x17   : > { %p470_p6 = pneg %p469_p3 }
  0x19   : > { %p475_p8 = pnand %p473_p7, %p470_p6 }
  0x1b   : > { %478 = shalt.err (!%p475_p8)
}
  0x1c   : > { %375 = dma.hbm_to_vmem [thread:$0]  (!%p373_p13), %s151_s28, 128, %s153_s25, [#allocation4]  }
  0x1d   : > { %161 = sbr.rel (%p609_p5) target bundleno = 705 (0x2c1), region = 28  ;;  %s163_s6 = sand.u32 (!%p609_p5), 1, %s533_s10  }
  0x1e   : > { %s355_s7 = sshll.u32 (!%p609_p5), %s163_s6, 3  ;;  %s164_s8 = scalar_lea.sflag (!%p609_p5), [#allocation4], %s163_s6 }
  0x1f   : > { %s167_s9 = scalar_lea.vmem (!%p609_p5), [#allocation3], %s355_s7 }
  0x22   : > { %519 = dma.done.wait (%p602_p4), %s164_s8, 128  }
  0x23   : > { %521 = vsyncadd (%p602_p4), %s164_s8, 4294967168 }
  0x24   : > { %523 = dma.done.wait (%p594_p1), [#allocation6], 16  }
  0x25   : > { %525 = vsyncadd (%p594_p1), [#allocation6], 4294967280  ;;  %vm202_vm0 = vcmask 0   ;;  %v549_v0 = vmov 0.0   ;;  %v204_v1 = vld [vmem:[%s167_s9] sm:$0xff]  ;;  %s550_s14 = smov 19   ;;  %v236_v9 = vlaneseq }
  0x26   : > { %203 = vst.msk [vmem:[#allocation2] sm:$0x1] %vm202_vm0, %v549_v0  ;;  %v433_v2 = vld [vmem:[#allocation5] ss:$0 sm:$0xff]  ;;  %s551_s16 = smov 109   ;;  %s552_s17 = smov 108  }
  0x27   : > { %v209_v3 = vadd.f32 %v433_v2, %v204_v1  ;;  %229 = vrot.lane.b32.xlu2 %v204_v1, %s552_s17  ;;  %vm219_vm1 = vcmask 146432   ;;  %s357_s15 = sshll.u32 %s537_s11, 3  ;;  %v237_v12 = vshrl.u32 %v236_v9, 7  ;;  %s553_s18 = smov 110   ;;  %vm249_vm3 = vcmask 7168  }
  0x28   : > { %v240_v13 = vstv %s357_s15  ;;  %p195_p1 = scmp.lt.s32.totalorder %s537_s11, 1 }
  0x29   : > { %211 = vrot.lane.b32.xlu0 %v209_v3, %s550_s14  ;;  %v241_v16 = vadd.s32 %v240_v13, %v237_v12 }
  0x2a   : > { %s675_s11 = smov (!%p195_p1, %s537_s11), 1 }
  0x2b   : > { %vm242_vm2 = vcmp.lt.s32.totalorder %v241_v16, 8  ;;  %s197_s22 = scalar_lea.vmem %s665_s2, %s675_s11 }
  0x2d   : > { %v244_v31 = vld [vmem:[#allocation2] sm:$0x1] }
  0x81   : > { %v230_v11 = vpop.permute.xlu2 %229 }
  0x9b   : > { %v212_v4 = vpop.permute.xlu0 %211 }
  0x9c   : > { %v214_v5 = vmul.f32 %v212_v4, %v204_v1 }
  0x9e   : > { %216 = vrot.lane.b32.xlu0 %v214_v5, %s551_s16 }
 0x110   : > { %v217_v6 = vpop.permute.xlu0 %216 }
 0x111   : > { %v220_v7 = vsel %vm219_vm1, %v217_v6, 0.0 }
 0x112   : > { %221 = vadd.xlane.f32.xlu1 %v220_v7 }
 0x12b   : > { %225 = vrot.lane.b32.xlu1 %v204_v1, %s551_s16 }
 0x185   : > { %v222_v8 = vpop.xlane.xlu1 %221 }
 0x186   : > { %v223_v10 = vadd.f32 %v222_v8, %v204_v1 }
 0x188   : > { %v232_v14 = vsub.f32 %v223_v10, %v230_v11 }
 0x18a   : > { %v234_v18 = vmul.f32 %v232_v14, %v232_v14 }
 0x19d   : > { %v226_v15 = vpop.permute.xlu1 %225 }
 0x19e   : > { %v228_v17 = vsub.f32 %v223_v10, %v226_v15 }
 0x1a0   : > { %v233_v19 = vmul.f32 %v228_v17, %v228_v17 }
 0x1a2   : > { %v235_v20 = vadd.f32 %v234_v18, %v233_v19 }
 0x1a4   : > { %v243_v21 = vsel %vm242_vm2, %v235_v20, 0.0 }
 0x1a5   : > { %246 = vrot.lane.b32.xlu2 %v243_v21, %s553_s18 }
 0x1ff   : > { %v247_v22 = vpop.permute.xlu2 %246 }
 0x200   : > { %v250_v23 = vsel %vm249_vm3, %v247_v22, 0.0 }
 0x201   : > { %251 = vadd.xlane.f32.xlu0 %v250_v23 }
 0x274   : > { %v252_v24 = vpop.xlane.xlu0 %251 }
 0x275   : > { %v253_v25 = vrot.slane %v252_v24, 4 }
 0x277   : > { %v254_v26 = vadd.f32 %v253_v25, %v252_v24 }
 0x279   : > { %v255_v27 = vrot.slane %v254_v26, 2 }
 0x27b   : > { %v256_v28 = vadd.f32 %v255_v27, %v254_v26 }
 0x27d   : > { %v257_v29 = vrot.slane %v256_v28, 1 }
 0x27f   : > { %v258_v30 = vadd.f32 %v257_v29, %v256_v28 }
 0x281   : > { %360 = vpush %v258_v30 }
 0x2b2   : > { %s361_s19 = spop %360 }
 0x2b3   : > { %v260_v32 = vstv %s361_s19 }
 0x2b4   : > { %v261_v33 = vadd.f32 %v260_v32, %v244_v31 }
 0x2b6   : > { %263 = vst.msk [vmem:[#allocation2] sm:$0x1] %vm202_vm0, %v261_v33 }
 0x2bd   : > { %v267_v34 = vld [vmem:[#allocation2] sm:$0x1] }
 0x2be   : > { %v268_v35 = vmul.f32 0.125, %v267_v34 }
 0x2c0   : > { %269 = vst.msk [vmem:[%s197_s22] sm:$0x1] %vm202_vm0, %v268_v35 }
 0x2c1 PF: > { %s16_s13 = sadd.s32 1, %s545_s13   ;;  %s669_s9 = smov %s533_s10 }
 0x2c2   : > { %p13_p4 = scmp.ge.s32.totalorder %s16_s13, 4   ;;  %s653_s10 = smov 0  }
 0x2c3   : > { %s670_s11 = smov %s541_s12  ;;  %s671_s12 = smov %s673_s23 }
 0x2c4   :  { %15 = sbr.rel (!%p13_p4) target bundleno = 5 (0x5), region = 80 }
 0x2c9   :  { %287 = vsyncpa [#allocation4], 1 }
 0x2ca   :  { %289 = vsyncpa [#allocation4 + $0x1], 1 }
 0x2cb   :  { %290 = vsyncpa [#allocation6], 1 }

</bundles_post_ra>
